<compile_context>
chip_gen: v7x
topology: tpu7x:2x2x1
jax: 0.10.0
libtpu: 0.0.40
codegen_flags: <defaults>
</compile_context>

<pallas_src>
import functools

import jax
import jax.numpy as jnp
from jax import lax
from jax.experimental import pallas as pl
from jax.experimental.pallas import tpu as pltpu


# ----------------------------------------------------------------------------
# tiling helpers
# ----------------------------------------------------------------------------
def _pick_tile(total, cap, quantum):
    """Largest t <= cap with total % t == 0 and t % quantum == 0 (else total)."""
    if total <= cap:
        return total
    t = (cap // quantum) * quantum
    while t >= quantum:
        if total % t == 0:
            return t
        t -= quantum
    return total


def _pick_row_tile(h):
    """Row-strip size for the spatial kernels (>=2 strips when possible)."""
    for cand in (8, 4, 2):
        if h % cand == 0 and h // cand >= 2:
            return cand
    return h


_VMEM_LIMIT = 48 * 1024 * 1024  # leaves headroom on v7x's 64 MiB VMEM


# ----------------------------------------------------------------------------
# Pallas kernels
# ----------------------------------------------------------------------------
def _mm_bias_kernel(x_ref, w_ref, b_ref, o_ref):
    """(TM, K) @ (K, TC) + bias.  bf16 operands, f32 accumulation."""
    acc = jnp.dot(x_ref[...], w_ref[...], preferred_element_type=jnp.float32)
    o_ref[...] = (acc + b_ref[...]).astype(o_ref.dtype)


def _ln_mm_gelu_kernel(x_ref, g_ref, be_ref, w_ref, b_ref, o_ref):
    """LayerNorm(last dim) -> (TM, K) @ (K, TC) + bias -> GELU (CNBlock fc1)."""
    x = x_ref[...]                                          # f32 (TM, K), K = full C
    mu = jnp.mean(x, axis=-1, keepdims=True)
    var = jnp.mean(jnp.square(x - mu), axis=-1, keepdims=True)
    xn = (x - mu) * lax.rsqrt(var + 1e-6)
    xn = xn * g_ref[...] + be_ref[...]
    acc = jnp.dot(xn.astype(jnp.bfloat16), w_ref[...],
                  preferred_element_type=jnp.float32)
    acc = acc + b_ref[...]
    o_ref[...] = jax.nn.gelu(acc, approximate=True).astype(o_ref.dtype)


def _mm_ls_res_kernel(x_ref, w_ref, b_ref, ls_ref, r_ref, o_ref):
    """(TM, K) @ (K, TC) + bias, * layer_scale, + residual (CNBlock fc2)."""
    acc = jnp.dot(x_ref[...], w_ref[...], preferred_element_type=jnp.float32)
    o_ref[...] = ((acc + b_ref[...]) * ls_ref[...] + r_ref[...]).astype(o_ref.dtype)


def _dwconv_kernel(x_ref, w_ref, b_ref, o_ref, *, KH, KW, TH, W):
    """Depthwise 7x7 conv, NHWC, one row strip of one image per grid step.

    x_ref : (Hp, Wp, C) f32   full padded image (resident across row tiles)
    w_ref : (KH*KW, C)  f32   per-channel taps (channels on lanes)
    b_ref : (1, C)      f32
    o_ref : (TH, W, C)  f32
    """
    r0 = pl.multiple_of(pl.program_id(1) * TH, TH)
    acc = jnp.zeros(o_ref.shape, jnp.float32)
    for kh in range(KH):
        rows = x_ref[pl.ds(r0 + kh, TH), :, :]              # (TH, Wp, C)
        for kw in range(KW):
            acc = acc + rows[:, kw:kw + W, :] * w_ref[kh * KW + kw]
    o_ref[...] = (acc + b_ref[0]).astype(o_ref.dtype)


def _smooth_max_kernel(x_ref, w_ref, b_ref, mx_ref, *, KH, KW, TH, W):
    """3x3 conv (pad 1) fused with spatial amax; only the max reaches HBM.

    x_ref  : (Hp, Wp, Cin)       f32   padded image slab (VMEM resident)
    w_ref  : (KH*KW, Cin, Cout)  bf16
    b_ref  : (1, Cout)           f32
    mx_ref : (1, Cout)           f32   running max across row tiles
    """
    r = pl.program_id(1)
    r0 = pl.multiple_of(r * TH, TH)
    Cin = x_ref.shape[-1]
    Cout = w_ref.shape[-1]
    acc = jnp.zeros((TH * W, Cout), jnp.float32)
    for kh in range(KH):
        rows = x_ref[pl.ds(r0 + kh, TH), :, :]              # (TH, Wp, Cin)
        for kw in range(KW):
            patch = rows[:, kw:kw + W, :].reshape(TH * W, Cin).astype(jnp.bfloat16)
            acc = acc + jnp.dot(patch, w_ref[kh * KW + kw],
                                preferred_element_type=jnp.float32)
    tile_max = jnp.max(acc + b_ref[...], axis=0, keepdims=True)

    @pl.when(r == 0)
    def _():
        mx_ref[...] = tile_max

    @pl.when(r > 0)
    def _():
        mx_ref[...] = jnp.maximum(mx_ref[...], tile_max)


# ----------------------------------------------------------------------------
# Wrappers
# ----------------------------------------------------------------------------
def _gemm(x2d, w2d, bias, *, mode="bias", ln=None, ls=None, residual=None):
    """Generic (M, K) @ (K, Cout) GEMM with fused epilogues.

    mode: "bias" | "ln_gelu" (LayerNorm on input + GELU epilogue)
          | "ls_res" (layer-scale + residual epilogue)
    """
    M, K = x2d.shape
    K2, Cout = w2d.shape
    assert K == K2
    TM = _pick_tile(M, 256, 8)
    TC = Cout if Cout <= 512 else _pick_tile(Cout, 512, 128)
    grid = (M // TM, Cout // TC)

    w_bf = w2d.astype(jnp.bfloat16)
    b2d = bias.reshape(1, Cout).astype(jnp.float32)

    x_spec = pl.BlockSpec((TM, K), lambda i, j: (i, 0))
    w_spec = pl.BlockSpec((K, TC), lambda i, j: (0, j))
    b_spec = pl.BlockSpec((1, TC), lambda i, j: (0, j))
    o_spec = pl.BlockSpec((TM, TC), lambda i, j: (i, j))

    if mode == "bias":
        kernel = _mm_bias_kernel
        operands = (x2d.astype(jnp.bfloat16), w_bf, b2d)
        in_specs = [x_spec, w_spec, b_spec]
    elif mode == "ln_gelu":
        g, be = ln
        kernel = _ln_mm_gelu_kernel
        operands = (x2d.astype(jnp.float32),
                    g.reshape(1, K).astype(jnp.float32),
                    be.reshape(1, K).astype(jnp.float32),
                    w_bf, b2d)
        in_specs = [x_spec,
                    pl.BlockSpec((1, K), lambda i, j: (0, 0)),
                    pl.BlockSpec((1, K), lambda i, j: (0, 0)),
                    w_spec, b_spec]
    elif mode == "ls_res":
        kernel = _mm_ls_res_kernel
        operands = (x2d.astype(jnp.bfloat16), w_bf, b2d,
                    ls.reshape(1, Cout).astype(jnp.float32),
                    residual.astype(jnp.float32))
        in_specs = [x_spec, w_spec, b_spec,
                    pl.BlockSpec((1, TC), lambda i, j: (0, j)),
                    o_spec]
    else:
        raise ValueError(mode)

    return pl.pallas_call(
        kernel,
        out_shape=jax.ShapeDtypeStruct((M, Cout), jnp.float32),
        grid_spec=pltpu.PrefetchScalarGridSpec(
            num_scalar_prefetch=0,
            grid=grid,
            in_specs=in_specs,
            out_specs=o_spec,
        ),
        compiler_params=pltpu.CompilerParams(
            dimension_semantics=("parallel", "parallel"),
            vmem_limit_bytes=_VMEM_LIMIT),
    )(*operands)


def depthwise_conv7x7_nhwc(x, weight, bias):
    """Depthwise Conv2d (groups=C, stride 1, pad KH//2). NHWC in/out.

    x: (N, H, W, C) f32; weight: (C, 1, KH, KW) PyTorch layout; bias: (C,).
    TODO(synk): could use bf16 taps/slab on v6e/v7x; kept f32 for v5e VPU compat.
    """
    N, H, W, C = x.shape
    KH, KW = weight.shape[2], weight.shape[3]
    ph, pw = KH // 2, KW // 2
    xp = jnp.pad(x.astype(jnp.float32), ((0, 0), (ph, ph), (pw, pw), (0, 0)))
    Hp, Wp = H + 2 * ph, W + 2 * pw
    TH = _pick_row_tile(H)
    w_tc = jnp.transpose(weight[:, 0], (1, 2, 0)).reshape(KH * KW, C).astype(jnp.float32)
    b = bias.reshape(1, C).astype(jnp.float32)

    kernel = functools.partial(_dwconv_kernel, KH=KH, KW=KW, TH=TH, W=W)
    return pl.pallas_call(
        kernel,
        out_shape=jax.ShapeDtypeStruct((N, H, W, C), jnp.float32),
        grid_spec=pltpu.PrefetchScalarGridSpec(
            num_scalar_prefetch=0,
            grid=(N, H // TH),
            in_specs=[
                pl.BlockSpec((None, Hp, Wp, C), lambda n, r: (n, 0, 0, 0)),
                pl.BlockSpec((KH * KW, C), lambda n, r: (0, 0)),
                pl.BlockSpec((1, C), lambda n, r: (0, 0)),
            ],
            out_specs=pl.BlockSpec((None, TH, W, C), lambda n, r: (n, r, 0, 0)),
        ),
        compiler_params=pltpu.CompilerParams(
            dimension_semantics=("parallel", "parallel"),
            vmem_limit_bytes=_VMEM_LIMIT),
    )(xp, w_tc, b)


def smooth1_amax_nhwc(x, weight, bias):
    """smooth1 (3x3 conv, pad 1) fused with amax over spatial dims.

    x: (N, H, W, Cin) f32; weight: (Cout, Cin, 3, 3); bias: (Cout,).
    Returns (N, Cout, 1, 1) f32 -- the conv output itself never hits HBM.
    """
    N, H, W, Cin = x.shape
    Cout, _, KH, KW = weight.shape
    ph, pw = KH // 2, KW // 2
    xp = jnp.pad(x.astype(jnp.float32), ((0, 0), (ph, ph), (pw, pw), (0, 0)))
    Hp, Wp = H + 2 * ph, W + 2 * pw
    TH = _pick_row_tile(H)
    w_t = jnp.transpose(weight, (2, 3, 1, 0)).reshape(KH * KW, Cin, Cout)
    w_t = w_t.astype(jnp.bfloat16)
    b = bias.reshape(1, Cout).astype(jnp.float32)

    kernel = functools.partial(_smooth_max_kernel, KH=KH, KW=KW, TH=TH, W=W)
    out = pl.pallas_call(
        kernel,
        out_shape=jax.ShapeDtypeStruct((N, 1, Cout), jnp.float32),
        grid_spec=pltpu.PrefetchScalarGridSpec(
            num_scalar_prefetch=0,
            grid=(N, H // TH),
            in_specs=[
                pl.BlockSpec((None, Hp, Wp, Cin), lambda n, r: (n, 0, 0, 0)),
                pl.BlockSpec((KH * KW, Cin, Cout), lambda n, r: (0, 0, 0)),
                pl.BlockSpec((1, Cout), lambda n, r: (0, 0)),
            ],
            out_specs=pl.BlockSpec((None, 1, Cout), lambda n, r: (n, 0, 0)),
        ),
        compiler_params=pltpu.CompilerParams(
            dimension_semantics=("parallel", "arbitrary"),  # running max over r
            vmem_limit_bytes=_VMEM_LIMIT),
    )(xp, w_t, b)
    return out.reshape(N, Cout, 1, 1)


# ----------------------------------------------------------------------------
# Plain-JAX glue
# ----------------------------------------------------------------------------
def _layer_norm_last(x, g, b, eps=1e-6):
    """LayerNorm over the channel (last) dim of an NHWC tensor (LayerNorm2d)."""
    mu = jnp.mean(x, axis=-1, keepdims=True)
    var = jnp.mean(jnp.square(x - mu), axis=-1, keepdims=True)
    return (x - mu) * lax.rsqrt(var + eps) * g + b


def _cn_block_nhwc(x, p):
    """torchvision CNBlock (eval): x + ls * fc2(GELU(fc1(LN(dwconv7x7(x))))).

    LN + GELU fused into the fc1 GEMM; layer-scale + residual fused into fc2.
    """
    N, H, W, C = x.shape
    M = N * H * W
    h = depthwise_conv7x7_nhwc(x, p["dw_w"], p["dw_b"])
    h1 = _gemm(h.reshape(M, C), p["fc1_w"].T, p["fc1_b"],
               mode="ln_gelu", ln=(p["ln_g"], p["ln_b"]))          # (M, 4C)
    out = _gemm(h1, p["fc2_w"].T, p["fc2_b"],
                mode="ls_res", ls=p["ls"], residual=x.reshape(M, C))
    return out.reshape(N, H, W, C)


def fpn_head2_forward(x, params):
    N, C4, H, W = x.shape
    # single layout change for the whole network; everything downstream is NHWC
    x_nhwc = jnp.transpose(x, (0, 2, 3, 1)).astype(jnp.float32)

    # --- downsample = LayerNorm2d + Conv2d(k=2, s=2) -------------------------
    xn = _layer_norm_last(x_nhwc, params["ds_ln_g"], params["ds_ln_b"])
    Ho, Wo = H // 2, W // 2
    C5 = params["ds_w"].shape[0]
    # space-to-depth: k=2/s=2 patches are disjoint -> pure reshape, no im2col blowup
    s2d = xn.reshape(N, Ho, 2, Wo, 2, C4).transpose(0, 1, 3, 2, 4, 5)
    s2d = s2d.reshape(N * Ho * Wo, 4 * C4)
    ds_w2d = jnp.transpose(params["ds_w"], (2, 3, 1, 0)).reshape(4 * C4, C5)
    h = _gemm(s2d, ds_w2d, params["ds_b"]).reshape(N, Ho, Wo, C5)

    # --- ConvNeXt stage (CNBlocks) -------------------------------------------
    for blk in params["blocks"]:
        h = _cn_block_nhwc(h, blk)
    c5 = h

    # --- FPN head --------------------------------------------------------------
    p5 = _gemm(c5.reshape(N * Ho * Wo, C5),
               params["top_w"][:, :, 0, 0].T, params["top_b"]).reshape(N, Ho, Wo, C4)
    lat = _gemm(x_nhwc.reshape(N * H * W, C4),
                params["lat_w"][:, :, 0, 0].T, params["lat_b"]).reshape(N, H, W, C4)
    # F.interpolate(..., mode='bilinear', align_corners=False) + lateral
    p5_up = jax.image.resize(p5, (N, H, W, C4), method="bilinear")
    p4 = p5_up + lat

    feat_res5 = smooth1_amax_nhwc(p4, params["sm_w"], params["sm_b"])  # fused amax
    feat_res4 = jnp.max(x, axis=(2, 3), keepdims=True)
    return {"feat_res4": feat_res4, "feat_res5": feat_res5}


# ----------------------------------------------------------------------------
# Parameter construction (deterministic, scaled-down channel counts)
# ----------------------------------------------------------------------------
def init_fpn_head2_params(key, c4, c5, num_blocks=3):
    keys = iter(jax.random.split(key, 64))

    def nrm(shape, scale=0.1):
        return scale * jax.random.normal(next(keys), shape, dtype=jnp.float32)

    params = {
        # convnext.features[6]: LayerNorm2d(c4) + Conv2d(c4, c5, 2, 2)
        "ds_ln_g": 1.0 + nrm((c4,)), "ds_ln_b": nrm((c4,)),
        "ds_w": nrm((c5, c4, 2, 2)), "ds_b": nrm((c5,)),
        # fpnHead2-defined layers (channel counts scaled 512->c4, 1024->c5)
        "top_w": nrm((c4, c5, 1, 1)), "top_b": nrm((c4,)),   # toplayer
        "lat_w": nrm((c4, c4, 1, 1)), "lat_b": nrm((c4,)),   # latlayer1
        "sm_w": nrm((c5, c4, 3, 3)), "sm_b": nrm((c5,)),     # smooth1
        "blocks": [],
    }
    for _ in range(num_blocks):
        params["blocks"].append({
            "dw_w": nrm((c5, 1, 7, 7)), "dw_b": nrm((c5,)),
            "ln_g": 1.0 + nrm((c5,)), "ln_b": nrm((c5,)),
            "fc1_w": nrm((4 * c5, c5)), "fc1_b": nrm((4 * c5,)),
            "fc2_w": nrm((c5, 4 * c5)), "fc2_b": nrm((c5,)),
            "ls": nrm((c5,)),
        })
    return params


# ----------------------------------------------------------------------------
# References for in-script sanity checks
# ----------------------------------------------------------------------------
def _conv_ref_nchw(x, w, b, stride, padding):
    y = lax.conv_general_dilated(
        x, w, (stride, stride), ((padding, padding), (padding, padding)),
        dimension_numbers=("NCHW", "OIHW", "NCHW"))
    return y + b.reshape(1, -1, 1, 1)


def _dwconv_ref_nchw(x, w, b):
    C = x.shape[1]
    p = w.shape[2] // 2
    y = lax.conv_general_dilated(
        x, w, (1, 1), ((p, p), (p, p)),
        dimension_numbers=("NCHW", "OIHW", "NCHW"), feature_group_count=C)
    return y + b.reshape(1, -1, 1, 1)


if __name__ == "__main__":
    # Scaled-down fpnHead2: 512 -> 8 channels (c4), 1024 -> 16 channels (c5).
    N, C4, H, W = 2, 8, 16, 16
    C5 = 2 * C4

    key = jax.random.PRNGKey(0)
    kx, kp, kv, kq = jax.random.split(key, 4)
    x = jax.random.normal(kx, (N, C4, H, W), dtype=jnp.float32)
    params = init_fpn_head2_params(kp, c4=C4, c5=C5, num_blocks=3)

    bf = lambda a: a.astype(jnp.bfloat16).astype(jnp.float32)
    x_nhwc = jnp.transpose(x, (0, 2, 3, 1))

    # --- 1x1 conv (latlayer1) via flipped GEMM vs lax.conv --------------------
    got = _gemm(x_nhwc.reshape(-1, C4), params["lat_w"][:, :, 0, 0].T,
                params["lat_b"]).reshape(N, H, W, C4).transpose(0, 3, 1, 2)
    ref = _conv_ref_nchw(bf(x), bf(params["lat_w"]), params["lat_b"], 1, 0)
    assert jnp.allclose(got, ref, atol=2e-2, rtol=2e-2), float(jnp.max(jnp.abs(got - ref)))

    # --- downsample 2x2/s2 conv via space-to-depth GEMM vs lax.conv -----------
    s2d = x_nhwc.reshape(N, H // 2, 2, W // 2, 2, C4).transpose(0, 1, 3, 2, 4, 5)
    s2d = s2d.reshape(-1, 4 * C4)
    ds_w2d = jnp.transpose(params["ds_w"], (2, 3, 1, 0)).reshape(4 * C4, C5)
    got = _gemm(s2d, ds_w2d, params["ds_b"]).reshape(N, H // 2, W // 2, C5)
    got = got.transpose(0, 3, 1, 2)
    ref = _conv_ref_nchw(bf(x), bf(params["ds_w"]), params["ds_b"], 2, 0)
    assert jnp.allclose(got, ref, atol=2e-2, rtol=2e-2), float(jnp.max(jnp.abs(got - ref)))

    # --- depthwise 7x7 conv vs lax depthwise conv (f32) ------------------------
    xs = jax.random.normal(kv, (N, C5, H // 2, W // 2), dtype=jnp.float32)
    got = depthwise_conv7x7_nhwc(jnp.transpose(xs, (0, 2, 3, 1)),
                                 params["blocks"][0]["dw_w"],
                                 params["blocks"][0]["dw_b"]).transpose(0, 3, 1, 2)
    ref = _dwconv_ref_nchw(xs, params["blocks"][0]["dw_w"], params["blocks"][0]["dw_b"])
    assert jnp.allclose(got, ref, atol=1e-4, rtol=1e-4), float(jnp.max(jnp.abs(got - ref)))

    # --- smooth1 3x3 conv + fused amax vs lax.conv + amax ----------------------
    p4r = jax.random.normal(kq, (N, C4, H, W), dtype=jnp.float32)
    got = smooth1_amax_nhwc(jnp.transpose(p4r, (0, 2, 3, 1)),
                            params["sm_w"], params["sm_b"])
    ref_feat = _conv_ref_nchw(bf(p4r), bf(params["sm_w"]), params["sm_b"], 1, 1)
    ref = jnp.max(ref_feat, axis=(2, 3), keepdims=True)
    assert jnp.allclose(got, ref, atol=3e-2, rtol=2e-2), float(jnp.max(jnp.abs(got - ref)))

    # --- full fpnHead2 forward --------------------------------------------------
    out = jax.jit(fpn_head2_forward)(x, params)
    out = jax.block_until_ready(out)
    assert out["feat_res4"].shape == (N, C4, 1, 1), out["feat_res4"].shape
    assert out["feat_res5"].shape == (N, C5, 1, 1), out["feat_res5"].shape
    assert jnp.allclose(out["feat_res4"], jnp.max(x, axis=(2, 3), keepdims=True))
    assert bool(jnp.isfinite(out["feat_res4"]).all())
    assert bool(jnp.isfinite(out["feat_res5"]).all())
    print("KERNEL_OK")
</pallas_src>

<mosaic_0001>
module attributes {stable_mosaic.version = 11 : i64} {
  func.func @_mm_bias_kernel(%arg0: i32, %arg1: i32, %arg2: memref<256x8xbf16, #tpu.memory_space<vmem>>, %arg3: memref<8x8xbf16, #tpu.memory_space<vmem>>, %arg4: memref<1x8xf32, #tpu.memory_space<vmem>>, %arg5: memref<256x8xf32, #tpu.memory_space<vmem>>) attributes {dimension_semantics = [#tpu.dimension_semantics<parallel>, #tpu.dimension_semantics<parallel>], iteration_bounds = array<i64: 2, 1>, scalar_prefetch = 0 : i64, scratch_operands = 0 : i64, tpu.core_type = #tpu.core_type<tc>, window_params = [{transform_indices = @transform_0, window_bounds = array<i64: 256, 8>}, {transform_indices = @transform_1, window_bounds = array<i64: 8, 8>}, {transform_indices = @transform_2, window_bounds = array<i64: 1, 8>}, {transform_indices = @transform_3, window_bounds = array<i64: 256, 8>}]} {
    %c0 = arith.constant 0 : index
    %c0_0 = arith.constant 0 : index
    %0 = vector.load %arg2[%c0, %c0_0] : memref<256x8xbf16, #tpu.memory_space<vmem>>, vector<256x8xbf16>
    %c0_1 = arith.constant 0 : index
    %c0_2 = arith.constant 0 : index
    %1 = vector.load %arg3[%c0_1, %c0_2] : memref<8x8xbf16, #tpu.memory_space<vmem>>, vector<8x8xbf16>
    %cst = arith.constant dense<0.000000e+00> : vector<256x8xf32>
    %2 = tpu.matmul %0, %1, %cst {dimension_numbers = #tpu.dot_dimension_numbers<[1], [0], [0], [1], [0, 0, 1, 1], [], []>} : vector<256x8xbf16>, vector<8x8xbf16>, vector<256x8xf32> -> vector<256x8xf32>
    %c0_3 = arith.constant 0 : index
    %c0_4 = arith.constant 0 : index
    %3 = vector.load %arg4[%c0_3, %c0_4] : memref<1x8xf32, #tpu.memory_space<vmem>>, vector<1x8xf32>
    %4 = vector.broadcast %3 : vector<1x8xf32> to vector<256x8xf32>
    %5 = arith.addf %2, %4 : vector<256x8xf32>
    %c0_5 = arith.constant 0 : index
    %c0_6 = arith.constant 0 : index
    %6 = vector.load %arg5[%c0_5, %c0_6] : memref<256x8xf32, #tpu.memory_space<vmem>>, vector<256x8xf32>
    tpu.vector_store %arg5[%c0_5, %c0_6], %5 {strides = array<i32>} : memref<256x8xf32, #tpu.memory_space<vmem>>, vector<256x8xf32>,
    return
  }
  func.func @transform_0(%arg0: i32, %arg1: i32) -> (i32, i32) {
    %c0_i32 = arith.constant 0 : i32
    %c0_i32_0 = arith.constant 0 : i32
    return %arg0, %c0_i32 : i32, i32
  }
  func.func @transform_1(%arg0: i32, %arg1: i32) -> (i32, i32) {
    %c0_i32 = arith.constant 0 : i32
    %c0_i32_0 = arith.constant 0 : i32
    return %c0_i32, %arg1 : i32, i32
  }
  func.func @transform_2(%arg0: i32, %arg1: i32) -> (i32, i32) {
    %c0_i32 = arith.constant 0 : i32
    %c0_i32_0 = arith.constant 0 : i32
    return %c0_i32, %arg1 : i32, i32
  }
  func.func @transform_3(%arg0: i32, %arg1: i32) -> (i32, i32) {
    %c0_i32 = arith.constant 0 : i32
    return %arg0, %arg1 : i32, i32
  }
}

</mosaic_0001>

<bundles_post_ra>
// kernel: tpu_custom_call.1
= control target key start
LH: loop header
LB: loop body
LE: loop exit
PB: predicated region body
PF: predicated region fallthrough
CT: control target
= control target key end

     0   :  { %s879_s12 = smov 0   ;;  %s881_s13 = smov 0   ;;  %s1056_s0 = inlined_call_operand.vmem [shape: bf16[512,8], index: 0, kind: input, shape index: {}]   ;;  %s1057_s1 = inlined_call_operand.vmem [shape: bf16[8,8], index: 1, kind: input, shape index: {}]   ;;  %s1058_s2 = inlined_call_operand.vmem [shape: f32[1,8], index: 2, kind: input, shape index: {}]   ;;  %s1059_s3 = inlined_call_operand.vmem [shape: f32[512,8], index: 3, kind: output, shape index: {}]  }
   0x1   :  { %s883_s14 = smov 0  }
   0x2 LB: > { %s25_s15 = sadd.s32 1, %s853_s13  ;;  %p700_p0 = scmp.ge.s32.totalorder %s857_s14, 1  ;;  %s857_s14 = sphi %s883_s14, %s13_s14   ;;  %s853_s13 = sphi %s881_s13, %s1061_s13   ;;  %s849_s12 = sphi %s879_s12, %s1060_s12  }
   0x3   : > { %p27_p1 = scmp.ge.s32.totalorder %s25_s15, 2  ;;  %p169_p2 = scmp.lt.s32.totalorder %s857_s14, 3 }
   0x5   : > { %s1063_s15 = smov (%p27_p1, %s25_s15), 0  ;;  %p170_p3 = pnand %p700_p0, %p169_p2 }
   0x6   : > { %v258_v0 = vld [vmem:[%s1057_s1] sm:$0xf] (!%p170_p3)  ;;  %vm395_vm0 = vcmask (!%p170_p3), 1043456   ;;  %s701_s18 = sshll.u32 (!%p170_p3), %s849_s12, 5  ;;  %vm346_vm1 = vcmask (!%p170_p3), 64512  }
   0x7   : > { %173 = sbr.rel (%p170_p3) target bundleno = 262 (0x106), region = 32  ;;  %793 = vmatprep.subr.msk.bf16.mxu0 (!%p170_p3), %vm395_vm0, %v258_v0  ;;  %794 = vmatprep.subr.msk.bf16.mxu1 (!%p170_p3), %vm395_vm0, %v258_v0  ;;  %v397_v1 = vsel (!%p170_p3), %vm395_vm0, %v258_v0, 0  ;;  %p204_p4 = scmp.lt.s32.totalorder (!%p170_p3), %s701_s18, 63  ;;  %v944_v18 = vld [vmem:[%s1058_s2] ss:$0 sm:$0xff] (!%p170_p3) }
   0x8   : > { %758 = vmatpush3.bf16.msra.mxu0 (!%p170_p3), %v397_v1  ;;  %792 = vmatpush3.bf16.msra.mxu1 (!%p170_p3), %v397_v1 }
   0xe   : > { %s1065_s18 = smov (!%p204_p4, %s701_s18), 63 }
   0xf   : > { %s702_s19 = sshll.u32 %s1065_s18, 2  ;;  %s704_s23 = sshll.u32 %s1065_s18, 3 }
  0x10   : > { %s906_s22 = scalar_lea.vmem %s1056_s0, %s702_s19  ;;  %s949_s28 = scalar_lea.vmem %s1059_s3, %s704_s23 }
  0x11   : > { %v819_v2 = vld [vmem:[%s906_s22] sm:$0xff]   ;;  %v821_v4 = vld [vmem:[%s906_s22 + $0x8] sm:$0xff]   ;;  %v823_v6 = vld [vmem:[%s906_s22 + $0x10] sm:$0xff]  }
  0x12   : > { %v820_v3 = vld [vmem:[%s906_s22 + $0x40] sm:$0xff]   ;;  %759 = vmatprep.mubr.msk.bf16.mxu0 %vm346_vm1, %v819_v2  ;;  %v822_v5 = vld [vmem:[%s906_s22 + $0x48] sm:$0xff]   ;;  %v824_v7 = vld [vmem:[%s906_s22 + $0x50] sm:$0xff]  }
  0x13   : > { %775 = vmatprep.mubr.msk.bf16.mxu1 %vm346_vm1, %v820_v3  ;;  %760 = vmatmul.mubr.msk.bf16.vlgmr.msra.gmra.mrb[0].mxu0 %vm346_vm1, %v821_v4  ;;  %v825_v8 = vld [vmem:[%s906_s22 + $0x18] sm:$0xff]   ;;  %v827_v10 = vld [vmem:[%s906_s22 + $0x20] sm:$0xff]   ;;  %v829_v12 = vld [vmem:[%s906_s22 + $0x28] sm:$0xff]  }
  0x14   : > { %776 = vmatmul.mubr.msk.bf16.vlgmr.msra.gmra.mrb[0].mxu1 %vm346_vm1, %v822_v5  ;;  %763 = vmatprep.mubr.msk.bf16.mxu0 %vm346_vm1, %v823_v6  ;;  %v826_v9 = vld [vmem:[%s906_s22 + $0x58] sm:$0xff]   ;;  %v828_v11 = vld [vmem:[%s906_s22 + $0x60] sm:$0xff]   ;;  %v830_v13 = vld [vmem:[%s906_s22 + $0x68] sm:$0xff]  }
  0x15   : > { %779 = vmatprep.mubr.msk.bf16.mxu1 %vm346_vm1, %v824_v7  ;;  %v831_v14 = vld [vmem:[%s906_s22 + $0x30] sm:$0xff]   ;;  %v833_v16 = vld [vmem:[%s906_s22 + $0x38] sm:$0xff]  }
  0x16   : > { %v832_v15 = vld [vmem:[%s906_s22 + $0x70] sm:$0xff]   ;;  %v834_v17 = vld [vmem:[%s906_s22 + $0x78] sm:$0xff]  }
  0x1b   : > { %764 = vmatmul.mubr.msk.bf16.gmra.mrb[4].mxu0 %vm346_vm1, %v825_v8 }
  0x1c   : > { %780 = vmatmul.mubr.msk.bf16.gmra.mrb[4].mxu1 %vm346_vm1, %v826_v9  ;;  %767 = vmatprep.mubr.msk.bf16.mxu0 %vm346_vm1, %v827_v10 }
  0x1d   : > { %783 = vmatprep.mubr.msk.bf16.mxu1 %vm346_vm1, %v828_v11 }
  0x23   : > { %768 = vmatmul.mubr.msk.bf16.gmra.mrb[8].mxu0 %vm346_vm1, %v829_v12 }
  0x24   : > { %784 = vmatmul.mubr.msk.bf16.gmra.mrb[8].mxu1 %vm346_vm1, %v830_v13  ;;  %771 = vmatprep.mubr.msk.bf16.mxu0 %vm346_vm1, %v831_v14 }
  0x25   : > { %787 = vmatprep.mubr.msk.bf16.mxu1 %vm346_vm1, %v832_v15 }
  0x2b   : > { %772 = vmatmul.mubr.msk.bf16.gmra.mrb[12].mxu0 %vm346_vm1, %v833_v16 }
  0x2c   : > { %788 = vmatmul.mubr.msk.bf16.gmra.mrb[12].mxu1 %vm346_vm1, %v834_v17 }
  0xe6   : > { %v761_v19 = vpop.f32.mrb[0].mxu0 }
  0xe7   : > { %v442_v20 = vadd.f32 %v761_v19, %v944_v18  ;;  %v777_v21 = vpop.f32.mrb[0].mxu1  ;;  %v433_v22 = vpop.f32.mrb[1].mxu0 }
  0xe8   : > { %v506_v23 = vadd.f32 %v777_v21, %v944_v18  ;;  %v434_v24 = vadd.f32 %v944_v18, %v433_v22  ;;  %v497_v25 = vpop.f32.mrb[1].mxu1  ;;  %v762_v26 = vpop.f32.mrb[2].mxu0 }
  0xe9   : > { %562 = vst.msk [vmem:[%s949_s28 + $0x10] sm:$0xff] %vm346_vm1, %v442_v20  ;;  %v498_v27 = vadd.f32 %v944_v18, %v497_v25  ;;  %v445_v28 = vadd.f32 %v762_v26, %v944_v18  ;;  %v778_v29 = vpop.f32.mrb[2].mxu1  ;;  %v436_v30 = vpop.f32.mrb[3].mxu0 }
  0xea   : > { %578 = vst.msk [vmem:[%s949_s28 + $0x90] sm:$0xff] %vm346_vm1, %v506_v23  ;;  %560 = vst.msk [vmem:[%s949_s28] sm:$0xff] %vm346_vm1, %v434_v24  ;;  %v509_v31 = vadd.f32 %v778_v29, %v944_v18  ;;  %v437_v32 = vadd.f32 %v944_v18, %v436_v30  ;;  %v500_v33 = vpop.f32.mrb[3].mxu1 }
  0xeb   : > { %576 = vst.msk [vmem:[%s949_s28 + $0x80] sm:$0xff] %vm346_vm1, %v498_v27  ;;  %563 = vst.msk [vmem:[%s949_s28 + $0x18] sm:$0xff] %vm346_vm1, %v445_v28  ;;  %v501_v34 = vadd.f32 %v944_v18, %v500_v33 }
  0xec   : > { %579 = vst.msk [vmem:[%s949_s28 + $0x98] sm:$0xff] %vm346_vm1, %v509_v31  ;;  %561 = vst.msk [vmem:[%s949_s28 + $0x8] sm:$0xff] %vm346_vm1, %v437_v32 }
  0xed   : > { %577 = vst.msk [vmem:[%s949_s28 + $0x88] sm:$0xff] %vm346_vm1, %v501_v34 }
  0xee   : > { %v765_v35 = vpop.f32.mrb[4].mxu0 }
  0xef   : > { %v458_v36 = vadd.f32 %v765_v35, %v944_v18  ;;  %v781_v37 = vpop.f32.mrb[4].mxu1  ;;  %v449_v38 = vpop.f32.mrb[5].mxu0 }
  0xf0   : > { %v522_v39 = vadd.f32 %v781_v37, %v944_v18  ;;  %v450_v40 = vadd.f32 %v944_v18, %v449_v38  ;;  %v513_v41 = vpop.f32.mrb[5].mxu1  ;;  %v766_v42 = vpop.f32.mrb[6].mxu0 }
  0xf1   : > { %566 = vst.msk [vmem:[%s949_s28 + $0x30] sm:$0xff] %vm346_vm1, %v458_v36  ;;  %v514_v43 = vadd.f32 %v944_v18, %v513_v41  ;;  %v461_v44 = vadd.f32 %v766_v42, %v944_v18  ;;  %v782_v45 = vpop.f32.mrb[6].mxu1  ;;  %v452_v46 = vpop.f32.mrb[7].mxu0 }
  0xf2   : > { %582 = vst.msk [vmem:[%s949_s28 + $0xb0] sm:$0xff] %vm346_vm1, %v522_v39  ;;  %564 = vst.msk [vmem:[%s949_s28 + $0x20] sm:$0xff] %vm346_vm1, %v450_v40  ;;  %v525_v47 = vadd.f32 %v782_v45, %v944_v18  ;;  %v453_v48 = vadd.f32 %v944_v18, %v452_v46  ;;  %v516_v49 = vpop.f32.mrb[7].mxu1 }
  0xf3   : > { %580 = vst.msk [vmem:[%s949_s28 + $0xa0] sm:$0xff] %vm346_vm1, %v514_v43  ;;  %567 = vst.msk [vmem:[%s949_s28 + $0x38] sm:$0xff] %vm346_vm1, %v461_v44  ;;  %v517_v50 = vadd.f32 %v944_v18, %v516_v49 }
  0xf4   : > { %583 = vst.msk [vmem:[%s949_s28 + $0xb8] sm:$0xff] %vm346_vm1, %v525_v47  ;;  %565 = vst.msk [vmem:[%s949_s28 + $0x28] sm:$0xff] %vm346_vm1, %v453_v48 }
  0xf5   : > { %581 = vst.msk [vmem:[%s949_s28 + $0xa8] sm:$0xff] %vm346_vm1, %v517_v50 }
  0xf6   : > { %v769_v51 = vpop.f32.mrb[8].mxu0 }
  0xf7   : > { %v474_v52 = vadd.f32 %v769_v51, %v944_v18  ;;  %v785_v53 = vpop.f32.mrb[8].mxu1  ;;  %v465_v54 = vpop.f32.mrb[9].mxu0 }
  0xf8   : > { %v538_v55 = vadd.f32 %v785_v53, %v944_v18  ;;  %v466_v56 = vadd.f32 %v944_v18, %v465_v54  ;;  %v529_v57 = vpop.f32.mrb[9].mxu1  ;;  %v770_v58 = vpop.f32.mrb[10].mxu0 }
  0xf9   : > { %570 = vst.msk [vmem:[%s949_s28 + $0x50] sm:$0xff] %vm346_vm1, %v474_v52  ;;  %v530_v59 = vadd.f32 %v944_v18, %v529_v57  ;;  %v477_v60 = vadd.f32 %v770_v58, %v944_v18  ;;  %v786_v61 = vpop.f32.mrb[10].mxu1  ;;  %v468_v62 = vpop.f32.mrb[11].mxu0 }
  0xfa   : > { %586 = vst.msk [vmem:[%s949_s28 + $0xd0] sm:$0xff] %vm346_vm1, %v538_v55  ;;  %568 = vst.msk [vmem:[%s949_s28 + $0x40] sm:$0xff] %vm346_vm1, %v466_v56  ;;  %v541_v63 = vadd.f32 %v786_v61, %v944_v18  ;;  %v469_v0 = vadd.f32 %v944_v18, %v468_v62  ;;  %v532_v1 = vpop.f32.mrb[11].mxu1 }
  0xfb   : > { %584 = vst.msk [vmem:[%s949_s28 + $0xc0] sm:$0xff] %vm346_vm1, %v530_v59  ;;  %571 = vst.msk [vmem:[%s949_s28 + $0x58] sm:$0xff] %vm346_vm1, %v477_v60  ;;  %v533_v2 = vadd.f32 %v944_v18, %v532_v1 }
  0xfc   : > { %587 = vst.msk [vmem:[%s949_s28 + $0xd8] sm:$0xff] %vm346_vm1, %v541_v63  ;;  %569 = vst.msk [vmem:[%s949_s28 + $0x48] sm:$0xff] %vm346_vm1, %v469_v0 }
  0xfd   : > { %585 = vst.msk [vmem:[%s949_s28 + $0xc8] sm:$0xff] %vm346_vm1, %v533_v2 }
  0xfe   : > { %v773_v3 = vpop.f32.mrb[12].mxu0 }
  0xff   : > { %v490_v4 = vadd.f32 %v773_v3, %v944_v18  ;;  %v789_v5 = vpop.f32.mrb[12].mxu1  ;;  %v481_v6 = vpop.f32.mrb[13].mxu0 }
 0x100   : > { %v554_v7 = vadd.f32 %v789_v5, %v944_v18  ;;  %v482_v8 = vadd.f32 %v944_v18, %v481_v6  ;;  %v545_v9 = vpop.f32.mrb[13].mxu1  ;;  %v774_v10 = vpop.f32.mrb[14].mxu0 }
 0x101   : > { %574 = vst.msk [vmem:[%s949_s28 + $0x70] sm:$0xff] %vm346_vm1, %v490_v4  ;;  %v546_v11 = vadd.f32 %v944_v18, %v545_v9  ;;  %v493_v12 = vadd.f32 %v774_v10, %v944_v18  ;;  %v790_v13 = vpop.f32.mrb[14].mxu1  ;;  %v484_v14 = vpop.f32.mrb[15].mxu0 }
 0x102   : > { %590 = vst.msk [vmem:[%s949_s28 + $0xf0] sm:$0xff] %vm346_vm1, %v554_v7  ;;  %572 = vst.msk [vmem:[%s949_s28 + $0x60] sm:$0xff] %vm346_vm1, %v482_v8  ;;  %v557_v15 = vadd.f32 %v790_v13, %v944_v18  ;;  %v485_v16 = vadd.f32 %v944_v18, %v484_v14  ;;  %v548_v17 = vpop.f32.mrb[15].mxu1 }
 0x103   : > { %588 = vst.msk [vmem:[%s949_s28 + $0xe0] sm:$0xff] %vm346_vm1, %v546_v11  ;;  %575 = vst.msk [vmem:[%s949_s28 + $0x78] sm:$0xff] %vm346_vm1, %v493_v12  ;;  %v549_v19 = vadd.f32 %v944_v18, %v548_v17 }
 0x104   : > { %591 = vst.msk [vmem:[%s949_s28 + $0xf8] sm:$0xff] %vm346_vm1, %v557_v15  ;;  %573 = vst.msk [vmem:[%s949_s28 + $0x68] sm:$0xff] %vm346_vm1, %v485_v16 }
 0x105   : > { %589 = vst.msk [vmem:[%s949_s28 + $0xe8] sm:$0xff] %vm346_vm1, %v549_v19 }
 0x106 PF: > { %s13_s14 = sadd.s32 1, %s857_s14   ;;  %s1060_s12 = smov %s853_s13 }
 0x107   : > { %p10_p5 = scmp.ge.s32.totalorder %s13_s14, 4   ;;  %s1061_s13 = smov %s1063_s15 }
 0x109   :  { %12 = sbr.rel (!%p10_p5) target bundleno = 2 (0x2), region = 68 }

</bundles_post_ra>
